<compile_context>
chip_gen: v7x
topology: tpu7x:2x2x1
jax: 0.10.0
libtpu: 0.0.40
codegen_flags: <defaults>
</compile_context>

<pallas_src>
import jax
import jax.numpy as jnp
from jax.experimental import pallas as pl
from jax.experimental.pallas import tpu as pltpu


def _round_up(x, m):
    return ((x + m - 1) // m) * m


def _gru_stack_kernel(x0_ref, h_ref, wih_ref, whh_ref, bi_ref, bh_ref,
                      hnew_ref, x_carry):
    """One grid step == one GRU layer.

    x0_ref:   (Bpad, Dpad)        f32, padded input to layer 0
    h_ref:    (1, Bpad, Hpad)     f32, previous hidden for this layer
    wih_ref:  (1, Dpad, 3*Hpad)   bf16, input->hidden weights, gate slabs [r|z|n]
    whh_ref:  (1, Hpad, 3*Hpad)   bf16, hidden->hidden weights, gate slabs [r|z|n]
    bi_ref:   (1, 1, 3*Hpad)      f32, [b_ih_r+b_hh_r | b_ih_z+b_hh_z | b_ih_n]
    bh_ref:   (1, 1, 3*Hpad)      f32, [0 | 0 | b_hh_n]
    hnew_ref: (1, Bpad, Hpad)     f32, new hidden for this layer
    x_carry:  (Bpad, Dpad)        f32 VMEM scratch carrying the layer input
    """
    layer = pl.program_id(0)

    @pl.when(layer == 0)
    def _():
        x_carry[...] = x0_ref[...]

    Hp = whh_ref.shape[-1] // 3                       # padded hidden width (static)

    x = x_carry[...].astype(jnp.bfloat16)             # (Bpad, Dpad)
    h = h_ref[0]                                      # (Bpad, Hpad) f32

    # MXU matmuls, bf16 operands, f32 accumulate; biases broadcast over batch.
    gi = jnp.dot(x, wih_ref[0], preferred_element_type=jnp.float32) + bi_ref[0]
    gh = jnp.dot(h.astype(jnp.bfloat16), whh_ref[0],
                 preferred_element_type=jnp.float32) + bh_ref[0]

    r = jax.nn.sigmoid(gi[:, 0 * Hp:1 * Hp] + gh[:, 0 * Hp:1 * Hp])
    z = jax.nn.sigmoid(gi[:, 1 * Hp:2 * Hp] + gh[:, 1 * Hp:2 * Hp])
    n = jnp.tanh(gi[:, 2 * Hp:3 * Hp] + r * gh[:, 2 * Hp:3 * Hp])
    h_new = (1.0 - z) * n + z * h                     # (Bpad, Hpad) f32

    hnew_ref[0] = h_new.astype(hnew_ref.dtype)
    # Carry to the next layer (columns beyond Hp are ignored: their weight rows are 0).
    x_carry[:, :Hp] = h_new


def _gru_forward(inp, h_state, w_ih_t, w_hh_t, b_i, b_h):
    """inp: (B, indim); h_state: (B, L, hdim). Returns (out (B, hdim), new_state (B, L, hdim))."""
    B, indim = inp.shape
    hdim = h_state.shape[-1]
    L, Dpad, H3 = w_ih_t.shape
    Hpad = H3 // 3
    Bpad = max(8, _round_up(B, 8))                    # fill sublanes / MXU rows

    # Pad input and state into lane/sublane-aligned slabs (padded regions are zero and
    # multiply zero-padded weight rows, so they never affect real outputs).
    x0 = jnp.zeros((Bpad, Dpad), jnp.float32).at[:B, :indim].set(inp.astype(jnp.float32))
    h_lbh = jnp.zeros((L, Bpad, Hpad), jnp.float32).at[:, :B, :hdim].set(
        jnp.transpose(h_state.astype(jnp.float32), (1, 0, 2)))

    bytes_accessed = (w_ih_t.size * w_ih_t.dtype.itemsize
                      + w_hh_t.size * w_hh_t.dtype.itemsize
                      + (b_i.size + b_h.size) * 4
                      + x0.size * 4 + 2 * h_lbh.size * 4)

    new_h = pl.pallas_call(
        _gru_stack_kernel,
        out_shape=jax.ShapeDtypeStruct((L, Bpad, Hpad), jnp.float32),
        grid_spec=pltpu.PrefetchScalarGridSpec(
            num_scalar_prefetch=0,
            grid=(L,),
            in_specs=[
                pl.BlockSpec((Bpad, Dpad), lambda l: (0, 0)),          # x0 (layer-0 input)
                pl.BlockSpec((1, Bpad, Hpad), lambda l: (l, 0, 0)),    # h_prev per layer
                pl.BlockSpec((1, Dpad, 3 * Hpad), lambda l: (l, 0, 0)),  # W_ih^T per layer
                pl.BlockSpec((1, Hpad, 3 * Hpad), lambda l: (l, 0, 0)),  # W_hh^T per layer
                pl.BlockSpec((1, 1, 3 * Hpad), lambda l: (l, 0, 0)),   # folded input bias
                pl.BlockSpec((1, 1, 3 * Hpad), lambda l: (l, 0, 0)),   # n-gate hidden bias
            ],
            out_specs=pl.BlockSpec((1, Bpad, Hpad), lambda l: (l, 0, 0)),
            scratch_shapes=[pltpu.VMEM((Bpad, Dpad), jnp.float32)],    # layer-input carry
        ),
        input_output_aliases={1: 0},   # write new hidden state over the h-state buffer
        compiler_params=pltpu.CompilerParams(
            dimension_semantics=("arbitrary",),        # layers are sequentially dependent
            # NOTE: for production-size H on v7x (64 MiB VMEM) set vmem_limit_bytes and/or
            # tile the 3H dimension with an extra grid axis.
        ),
        cost_estimate=pl.CostEstimate(
            flops=2 * L * Bpad * (Dpad + Hpad) * 3 * Hpad,
            transcendentals=3 * L * Bpad * Hpad,
            bytes_accessed=bytes_accessed,
        ),
    )(x0, h_lbh, w_ih_t, w_hh_t, b_i, b_h)

    out = new_h[L - 1, :B, :hdim].astype(inp.dtype)                      # last layer hidden
    new_state = jnp.transpose(new_h[:, :B, :hdim], (1, 0, 2)).astype(h_state.dtype)
    return out, new_state


_gru_forward_jit = jax.jit(_gru_forward)


class GRUTransition:
    """JAX/Pallas port of parseq GRUTransition (eval mode, dropout=0)."""

    def __init__(self, indim, hdim, num_layers=1, dropout=0.0, dropout_rec=0.0, key=None):
        self.indim, self.hdim, self.numlayers = indim, hdim, num_layers
        # TODO(synk): dropout / dropout_rec are identity at p=0.0 (the module default);
        # stochastic dropout masks are not implemented in-kernel.
        assert dropout == 0.0 and dropout_rec == 0.0

        if key is None:
            key = jax.random.PRNGKey(0)
        bound = 1.0 / (hdim ** 0.5)

        L = num_layers
        Hpad = _round_up(hdim, 128)
        Dpad = _round_up(max(indim, hdim), 128)
        self._Hpad, self._Dpad = Hpad, Dpad

        w_ih_t = jnp.zeros((L, Dpad, 3 * Hpad), jnp.float32)
        w_hh_t = jnp.zeros((L, Hpad, 3 * Hpad), jnp.float32)
        b_i = jnp.zeros((L, 1, 3 * Hpad), jnp.float32)
        b_h = jnp.zeros((L, 1, 3 * Hpad), jnp.float32)

        self.params = []   # PyTorch-layout f32 params kept for the reference check
        for layer in range(L):
            din = indim if layer == 0 else hdim
            key, k1, k2, k3, k4 = jax.random.split(key, 5)
            w_ih = jax.random.uniform(k1, (3 * hdim, din), jnp.float32, -bound, bound)
            w_hh = jax.random.uniform(k2, (3 * hdim, hdim), jnp.float32, -bound, bound)
            b_ih = jax.random.uniform(k3, (3 * hdim,), jnp.float32, -bound, bound)
            b_hh = jax.random.uniform(k4, (3 * hdim,), jnp.float32, -bound, bound)
            self.params.append((w_ih, w_hh, b_ih, b_hh))

            for g in range(3):   # gate order [r, z, n], one 128-aligned slab per gate
                w_ih_g = jnp.transpose(w_ih[g * hdim:(g + 1) * hdim, :])   # (din, hdim)
                w_hh_g = jnp.transpose(w_hh[g * hdim:(g + 1) * hdim, :])   # (hdim, hdim)
                c0 = g * Hpad
                w_ih_t = w_ih_t.at[layer, :din, c0:c0 + hdim].set(w_ih_g)
                w_hh_t = w_hh_t.at[layer, :hdim, c0:c0 + hdim].set(w_hh_g)
                bi_g = b_ih[g * hdim:(g + 1) * hdim]
                bh_g = b_hh[g * hdim:(g + 1) * hdim]
                if g < 2:   # r, z: fold the two biases into one
                    b_i = b_i.at[layer, 0, c0:c0 + hdim].set(bi_g + bh_g)
                else:       # n: hidden bias must stay inside r*(...)
                    b_i = b_i.at[layer, 0, c0:c0 + hdim].set(bi_g)
                    b_h = b_h.at[layer, 0, c0:c0 + hdim].set(bh_g)

        # bf16 weight storage halves HBM->VMEM DMA; biases stay f32 (tiny).
        self.w_ih_t = w_ih_t.astype(jnp.bfloat16)
        self.w_hh_t = w_hh_t.astype(jnp.bfloat16)
        self.b_i = b_i
        self.b_h = b_h

    def get_init_state(self, batsize):
        # state.h == zeros; h_dropout is all-ones (identity) at dropout_rec=0.
        return jnp.zeros((batsize, self.numlayers, self.hdim), jnp.float32)

    def __call__(self, inp, h_state):
        """inp: (B, indim); h_state: (B, num_layers, hdim) -> (out, new_h_state)."""
        return _gru_forward_jit(inp, h_state, self.w_ih_t, self.w_hh_t, self.b_i, self.b_h)


def _gru_reference(inp, h_state, params, emulate_bf16=True):
    """Pure-jnp reference. With emulate_bf16=True it mirrors the kernel's bf16 matmul operands."""
    x = inp.astype(jnp.float32)
    new_hs = []
    for layer, (w_ih, w_hh, b_ih, b_hh) in enumerate(params):
        h = h_state[:, layer, :].astype(jnp.float32)
        H = h.shape[-1]
        if emulate_bf16:
            xm = x.astype(jnp.bfloat16).astype(jnp.float32)
            hm = h.astype(jnp.bfloat16).astype(jnp.float32)
            wi = w_ih.astype(jnp.bfloat16).astype(jnp.float32)
            wh = w_hh.astype(jnp.bfloat16).astype(jnp.float32)
        else:
            xm, hm, wi, wh = x, h, w_ih, w_hh
        gi = xm @ wi.T + b_ih
        gh = hm @ wh.T + b_hh
        r = jax.nn.sigmoid(gi[:, :H] + gh[:, :H])
        z = jax.nn.sigmoid(gi[:, H:2 * H] + gh[:, H:2 * H])
        n = jnp.tanh(gi[:, 2 * H:] + r * gh[:, 2 * H:])
        h_new = (1.0 - z) * n + z * h
        new_hs.append(h_new)
        x = h_new
    return x, jnp.stack(new_hs, axis=1)


if __name__ == "__main__":
    B, INDIM, HDIM, NLAYERS = 2, 32, 32, 2

    model = GRUTransition(INDIM, HDIM, num_layers=NLAYERS, key=jax.random.PRNGKey(0))

    key = jax.random.PRNGKey(0)
    k1, k2 = jax.random.split(key)
    inp1 = jax.random.normal(k1, (B, INDIM), jnp.float32)
    inp2 = jax.random.normal(k2, (B, INDIM), jnp.float32)
    h0 = model.get_init_state(B)

    # Two decode steps: second step exercises a non-zero recurrent state.
    out1, s1 = model(inp1, h0)
    out2, s2 = model(inp2, s1)
    out2 = jax.block_until_ready(out2)
    s2 = jax.block_until_ready(s2)

    assert out1.shape == (B, HDIM) and s1.shape == (B, NLAYERS, HDIM)
    assert out2.shape == (B, HDIM) and s2.shape == (B, NLAYERS, HDIM)

    # Correctness vs a pure-JAX reference that mirrors the kernel's bf16 matmul operands.
    r_out1, r_s1 = _gru_reference(inp1, h0, model.params)
    r_out2, r_s2 = _gru_reference(inp2, r_s1, model.params)
    assert jnp.allclose(out1, r_out1, atol=5e-3, rtol=5e-3)
    assert jnp.allclose(s1, r_s1, atol=5e-3, rtol=5e-3)
    assert jnp.allclose(out2, r_out2, atol=5e-3, rtol=5e-3)
    assert jnp.allclose(s2, r_s2, atol=5e-3, rtol=5e-3)

    # Sanity vs the exact-f32 math (bf16 weight rounding only).
    f_out2, f_s2 = _gru_reference(inp2, r_s1, model.params, emulate_bf16=False)
    assert jnp.allclose(out2, f_out2, atol=5e-2)
    assert jnp.allclose(s2, f_s2, atol=5e-2)

    print("KERNEL_OK")
</pallas_src>

<mosaic_0001>
module attributes {stable_mosaic.version = 11 : i64} {
  func.func @_gru_stack_kernel(%arg0: i32, %arg1: memref<8x128xf32, #tpu.memory_space<vmem>>, %arg2: memref<1x8x128xf32, #tpu.memory_space<vmem>>, %arg3: memref<1x128x384xbf16, #tpu.memory_space<vmem>>, %arg4: memref<1x128x384xbf16, #tpu.memory_space<vmem>>, %arg5: memref<1x1x384xf32, #tpu.memory_space<vmem>>, %arg6: memref<1x1x384xf32, #tpu.memory_space<vmem>>, %arg7: memref<1x8x128xf32, #tpu.memory_space<vmem>>, %arg8: memref<8x128xf32, #tpu.memory_space<vmem>>) attributes {dimension_semantics = [#tpu.dimension_semantics<arbitrary>], iteration_bounds = array<i64: 2>, scalar_prefetch = 0 : i64, scratch_operands = 1 : i64, tpu.core_type = #tpu.core_type<tc>, window_params = [{pipeline_mode = #tpu.pipeline_mode<synchronous>, transform_indices = @transform_0, window_bounds = array<i64: 8, 128>}, {transform_indices = @transform_1, window_bounds = array<i64: 1, 8, 128>}, {transform_indices = @transform_2, window_bounds = array<i64: 1, 128, 384>}, {transform_indices = @transform_3, window_bounds = array<i64: 1, 128, 384>}, {transform_indices = @transform_4, window_bounds = array<i64: 1, 1, 384>}, {transform_indices = @transform_5, window_bounds = array<i64: 1, 1, 384>}, {transform_indices = @transform_6, window_bounds = array<i64: 1, 8, 128>}]} {
    %c0_i32 = arith.constant 0 : i32
    %0 = arith.cmpi eq, %arg0, %c0_i32 : i32
    %1 = arith.extui %0 : i1 to i32
    %c0_i32_0 = arith.constant 0 : i32
    %2 = arith.cmpi ne, %1, %c0_i32_0 : i32
    scf.if %2 {
      %c0_26 = arith.constant 0 : index
      %c0_27 = arith.constant 0 : index
      %52 = vector.load %arg1[%c0_26, %c0_27] : memref<8x128xf32, #tpu.memory_space<vmem>>, vector<8x128xf32>
      %c0_28 = arith.constant 0 : index
      %c0_29 = arith.constant 0 : index
      %53 = vector.load %arg8[%c0_28, %c0_29] : memref<8x128xf32, #tpu.memory_space<vmem>>, vector<8x128xf32>
      tpu.vector_store %arg8[%c0_28, %c0_29], %52 {strides = array<i32>} : memref<8x128xf32, #tpu.memory_space<vmem>>, vector<8x128xf32>,
    } else {
    }
    %c0 = arith.constant 0 : index
    %c0_1 = arith.constant 0 : index
    %3 = vector.load %arg8[%c0, %c0_1] : memref<8x128xf32, #tpu.memory_space<vmem>>, vector<8x128xf32>
    %4 = arith.truncf %3 : vector<8x128xf32> to vector<8x128xbf16>
    %c0_2 = arith.constant 0 : index
    %c0_3 = arith.constant 0 : index
    %c0_4 = arith.constant 0 : index
    %5 = vector.load %arg2[%c0_2, %c0_3, %c0_4] : memref<1x8x128xf32, #tpu.memory_space<vmem>>, vector<1x8x128xf32>
    %6 = vector.shape_cast %5 : vector<1x8x128xf32> to vector<8x128xf32>
    %c0_5 = arith.constant 0 : index
    %c0_6 = arith.constant 0 : index
    %c0_7 = arith.constant 0 : index
    %7 = vector.load %arg3[%c0_5, %c0_6, %c0_7] : memref<1x128x384xbf16, #tpu.memory_space<vmem>>, vector<1x128x384xbf16>
    %8 = vector.shape_cast %7 : vector<1x128x384xbf16> to vector<128x384xbf16>
    %cst = arith.constant dense<0.000000e+00> : vector<8x384xf32>
    %9 = tpu.matmul %4, %8, %cst {dimension_numbers = #tpu.dot_dimension_numbers<[1], [0], [0], [1], [0, 0, 1, 1], [], []>} : vector<8x128xbf16>, vector<128x384xbf16>, vector<8x384xf32> -> vector<8x384xf32>
    %c0_8 = arith.constant 0 : index
    %c0_9 = arith.constant 0 : index
    %c0_10 = arith.constant 0 : index
    %10 = vector.load %arg5[%c0_8, %c0_9, %c0_10] : memref<1x1x384xf32, #tpu.memory_space<vmem>>, vector<1x1x384xf32>
    %11 = vector.shape_cast %10 : vector<1x1x384xf32> to vector<1x384xf32>
    %12 = vector.broadcast %11 : vector<1x384xf32> to vector<8x384xf32>
    %13 = arith.addf %9, %12 : vector<8x384xf32>
    %14 = arith.truncf %6 : vector<8x128xf32> to vector<8x128xbf16>
    %c0_11 = arith.constant 0 : index
    %c0_12 = arith.constant 0 : index
    %c0_13 = arith.constant 0 : index
    %15 = vector.load %arg4[%c0_11, %c0_12, %c0_13] : memref<1x128x384xbf16, #tpu.memory_space<vmem>>, vector<1x128x384xbf16>
    %16 = vector.shape_cast %15 : vector<1x128x384xbf16> to vector<128x384xbf16>
    %cst_14 = arith.constant dense<0.000000e+00> : vector<8x384xf32>
    %17 = tpu.matmul %14, %16, %cst_14 {dimension_numbers = #tpu.dot_dimension_numbers<[1], [0], [0], [1], [0, 0, 1, 1], [], []>} : vector<8x128xbf16>, vector<128x384xbf16>, vector<8x384xf32> -> vector<8x384xf32>
    %c0_15 = arith.constant 0 : index
    %c0_16 = arith.constant 0 : index
    %c0_17 = arith.constant 0 : index
    %18 = vector.load %arg6[%c0_15, %c0_16, %c0_17] : memref<1x1x384xf32, #tpu.memory_space<vmem>>, vector<1x1x384xf32>
    %19 = vector.shape_cast %18 : vector<1x1x384xf32> to vector<1x384xf32>
    %20 = vector.broadcast %19 : vector<1x384xf32> to vector<8x384xf32>
    %21 = arith.addf %17, %20 : vector<8x384xf32>
    %22 = vector.extract_strided_slice %13 {offsets = [0, 0], sizes = [8, 128], strides = [1, 1]} : vector<8x384xf32> to vector<8x128xf32>
    %23 = vector.extract_strided_slice %21 {offsets = [0, 0], sizes = [8, 128], strides = [1, 1]} : vector<8x384xf32> to vector<8x128xf32>
    %24 = arith.addf %22, %23 : vector<8x128xf32>
    %25 = arith.negf %24 : vector<8x128xf32>
    %26 = math.exp %25 : vector<8x128xf32>
    %cst_18 = arith.constant 1.000000e+00 : f32
    %27 = vector.broadcast %cst_18 : f32 to vector<8x128xf32>
    %28 = arith.addf %27, %26 : vector<8x128xf32>
    %29 = arith.divf %27, %28 : vector<8x128xf32>
    %30 = vector.extract_strided_slice %13 {offsets = [0, 128], sizes = [8, 128], strides = [1, 1]} : vector<8x384xf32> to vector<8x128xf32>
    %31 = vector.extract_strided_slice %21 {offsets = [0, 128], sizes = [8, 128], strides = [1, 1]} : vector<8x384xf32> to vector<8x128xf32>
    %32 = arith.addf %30, %31 : vector<8x128xf32>
    %33 = arith.negf %32 : vector<8x128xf32>
    %34 = math.exp %33 : vector<8x128xf32>
    %cst_19 = arith.constant 1.000000e+00 : f32
    %35 = vector.broadcast %cst_19 : f32 to vector<8x128xf32>
    %36 = arith.addf %35, %34 : vector<8x128xf32>
    %37 = arith.divf %35, %36 : vector<8x128xf32>
    %38 = vector.extract_strided_slice %13 {offsets = [0, 256], sizes = [8, 128], strides = [1, 1]} : vector<8x384xf32> to vector<8x128xf32>
    %39 = vector.extract_strided_slice %21 {offsets = [0, 256], sizes = [8, 128], strides = [1, 1]} : vector<8x384xf32> to vector<8x128xf32>
    %40 = arith.mulf %29, %39 : vector<8x128xf32>
    %41 = arith.addf %38, %40 : vector<8x128xf32>
    %42 = math.tanh %41 : vector<8x128xf32>
    %cst_20 = arith.constant 1.000000e+00 : f32
    %43 = vector.broadcast %cst_20 : f32 to vector<8x128xf32>
    %44 = arith.subf %43, %37 : vector<8x128xf32>
    %45 = arith.mulf %44, %42 : vector<8x128xf32>
    %46 = arith.mulf %37, %6 : vector<8x128xf32>
    %47 = arith.addf %45, %46 : vector<8x128xf32>
    %c0_21 = arith.constant 0 : index
    %c0_22 = arith.constant 0 : index
    %c0_23 = arith.constant 0 : index
    %48 = vector.load %arg7[%c0_21, %c0_22, %c0_23] : memref<1x8x128xf32, #tpu.memory_space<vmem>>, vector<1x8x128xf32>
    %49 = vector.shape_cast %48 : vector<1x8x128xf32> to vector<8x128xf32>
    %50 = vector.shape_cast %47 : vector<8x128xf32> to vector<1x8x128xf32>
    tpu.vector_store %arg7[%c0_21, %c0_22, %c0_23], %50 {strides = array<i32>} : memref<1x8x128xf32, #tpu.memory_space<vmem>>, vector<1x8x128xf32>,
    %c0_24 = arith.constant 0 : index
    %c0_25 = arith.constant 0 : index
    %51 = vector.load %arg8[%c0_24, %c0_25] : memref<8x128xf32, #tpu.memory_space<vmem>>, vector<8x128xf32>
    tpu.vector_store %arg8[%c0_24, %c0_25], %47 {strides = array<i32>} : memref<8x128xf32, #tpu.memory_space<vmem>>, vector<8x128xf32>,
    return
  }
  func.func @transform_0(%arg0: i32) -> (i32, i32) {
    %c0_i32 = arith.constant 0 : i32
    %c0_i32_0 = arith.constant 0 : i32
    %c0_i32_1 = arith.constant 0 : i32
    return %c0_i32, %c0_i32_0 : i32, i32
  }
  func.func @transform_1(%arg0: i32) -> (i32, i32, i32) {
    %c0_i32 = arith.constant 0 : i32
    %c0_i32_0 = arith.constant 0 : i32
    %c0_i32_1 = arith.constant 0 : i32
    return %arg0, %c0_i32, %c0_i32_0 : i32, i32, i32
  }
  func.func @transform_2(%arg0: i32) -> (i32, i32, i32) {
    %c0_i32 = arith.constant 0 : i32
    %c0_i32_0 = arith.constant 0 : i32
    %c0_i32_1 = arith.constant 0 : i32
    return %arg0, %c0_i32, %c0_i32_0 : i32, i32, i32
  }
  func.func @transform_3(%arg0: i32) -> (i32, i32, i32) {
    %c0_i32 = arith.constant 0 : i32
    %c0_i32_0 = arith.constant 0 : i32
    %c0_i32_1 = arith.constant 0 : i32
    return %arg0, %c0_i32, %c0_i32_0 : i32, i32, i32
  }
  func.func @transform_4(%arg0: i32) -> (i32, i32, i32) {
    %c0_i32 = arith.constant 0 : i32
    %c0_i32_0 = arith.constant 0 : i32
    %c0_i32_1 = arith.constant 0 : i32
    return %arg0, %c0_i32, %c0_i32_0 : i32, i32, i32
  }
  func.func @transform_5(%arg0: i32) -> (i32, i32, i32) {
    %c0_i32 = arith.constant 0 : i32
    %c0_i32_0 = arith.constant 0 : i32
    %c0_i32_1 = arith.constant 0 : i32
    return %arg0, %c0_i32, %c0_i32_0 : i32, i32, i32
  }
  func.func @transform_6(%arg0: i32) -> (i32, i32, i32) {
    %c0_i32 = arith.constant 0 : i32
    %c0_i32_0 = arith.constant 0 : i32
    %c0_i32_1 = arith.constant 0 : i32
    return %arg0, %c0_i32, %c0_i32_0 : i32, i32, i32
  }
}

</mosaic_0001>

<bundles_post_ra>
// kernel: _gru_forward.1
= control target key start
LH: loop header
LB: loop body
LE: loop exit
PB: predicated region body
PF: predicated region fallthrough
CT: control target
= control target key end

     0   :  { %11 = vsyncpa [#allocation4], 0  ;;  %s1705_s0 = inlined_call_operand.vmem [shape: f32[8,128], index: 0, kind: input, shape index: {}]   ;;  %s1706_s1 = inlined_call_operand.vmem [shape: f32[2,8,128], index: 1, kind: input, shape index: {}, may-alias: {1,6}]   ;;  %s1707_s2 = inlined_call_operand.hbm [shape: bf16[2,128,384], index: 2, kind: input, shape index: {}]   ;;  %s1708_s3 = inlined_call_operand.hbm [shape: bf16[2,128,384], index: 3, kind: input, shape index: {}]   ;;  %s1709_s4 = inlined_call_operand.vmem [shape: f32[2,1,384], index: 4, kind: input, shape index: {}]   ;;  %s1710_s5 = inlined_call_operand.vmem [shape: f32[2,1,384], index: 5, kind: input, shape index: {}]   ;;  %s1711_s6 = inlined_call_operand.vmem [shape: f32[2,8,128], index: 6, kind: output, shape index: {}, may-alias: {1,6}]  }
   0x1   :  { %13 = vsyncpa [#allocation4 + $0x1], 0 }
   0x2   :  { %14 = vsyncpa [#allocation6], 0 }
   0x3   :  { %16 = vsyncpa [#allocation6 + $0x1], 0  ;;  %s1433_s21 = smov 0   ;;  %s1435_s22 = smov 0  }
   0x4   :  { %s1437_s23 = smov 0   ;;  %s1439_s24 = smov 0  }
   0x5 LB: > { %s1452_s25 = sadd.s32 4294967295, %s1389_s24   ;;  %s1455_s26 = sadd.s32 1, %s1389_s24   ;;  %s1389_s24 = sphi %s1439_s24, %s1721_s24   ;;  %s1385_s23 = sphi %s1437_s23, %s1720_s23   ;;  %s1381_s22 = sphi %s1435_s22, %s1719_s22   ;;  %s1377_s21 = sphi %s1433_s21, %s1718_s21  }
   0x6   : > { %s73_s27 = ssub.s32 %s1389_s24, %s1455_s26  ;;  %s76_s28 = sadd.s32 1, %s1385_s23 }
   0x7   : > { %p74_p0 = scmp.eq.s32.totalorder %s73_s27, 0  ;;  %p83_p1 = scmp.ne.s32.totalorder %s1385_s23, %s1381_s22 }
   0x8   : > { %p84_p2 = scmp.eq.s32.totalorder %s1389_s24, 0  ;;  %p89_p3 = scmp.ne.s32.totalorder %s1381_s22, %s1377_s21 }
   0x9   : > { %s1465_s29 = scalar_select %p74_p0, %s1385_s23, %s76_s28  }
   0xa   : > { %p85_p4 = por %p84_p2, %p83_p1  ;;  %p90_p5 = scmp.eq.s32.totalorder %s1452_s25, 0 }
   0xb   : > { %p1179_p6 = scmp.lt.s32.totalorder %s1389_s24, 2  ;;  %s1474_s7 = sand.u32 1, %s1385_s23  }
   0xc   : > { %p1469_p7 = por %p90_p5, %p89_p3  ;;  %s1162_s8 = smul.u32 192, %s1474_s7 }
   0xd   : > { %s1163_s9 = smul.u32 3072, %s1389_s24  ;;  %p1478_p8 = pnand %p1179_p6, %p85_p4 }
   0xe   : > { %s1713_s30 = scalar_select %p1469_p7, 1, 0 }
   0xf   : > { %s1487_s13 = scalar_lea.hbm %s1707_s2, %s1163_s9  ;;  %s231_s14 = scalar_lea.vmem [#allocation3], %s1162_s8 }
  0x10   : > { %s238_s15 = sshll.u32 %s231_s14, 4  ;;  %s228_s16 = scalar_lea.sflag [#allocation4], %s1474_s7  ;;  %s1491_s15 = int_to_ptr.vmem [resolvable:$true] %s238_s15 }
  0x11   : > { %s1291_s17 = scalar_lea.hbm %s1487_s13, 3072  ;;  %p1293_p11 = pneg %p1478_p8 }
  0x12   : > { %p1292_p10 = scmp.ne.s32.totalorder %s1487_s13, %s1291_s17  ;;  %s1296_s20 = scalar_lea.hbm %s1707_s2, 6144 }
  0x13   : > { %p1297_p0 = scmp.lt.u32.totalorder %s1487_s13, %s1707_s2  ;;  %p1298_p1 = scmp.lt.u32.totalorder %s1296_s20, %s1291_s17 }
  0x14   : > { %p1294_p12 = pnand %p1293_p11, %p1292_p10  ;;  %p1300_p3 = scmp.lt.u32.totalorder %s1291_s17, %s1487_s13 }
  0x15   : > { %p1299_p2 = por %p1298_p1, %p1297_p0 }
  0x16   : > { %p1295_p13 = pneg %p1294_p12 }
  0x17   : > { %p1301_p4 = por %p1300_p3, %p1299_p2 }
  0x19   : > { %p1302_p5 = pnand %p1301_p4, %p1295_p13 }
  0x1b   : > { %1305 = shalt.err (!%p1302_p5)
}
  0x1c   : > { %s1306_s28 = scalar_lea.vmem %s1491_s15, 3072  ;;  %s1391_s11 = smov [#allocation3]  }
  0x1d   : > { %p1307_p6 = scmp.ne.s32.totalorder %s1491_s15, %s1306_s28  ;;  %s1311_s12 = sshll.u32 %s1391_s11, 4  ;;  %s1312_s12 = int_to_ptr.vmem [resolvable:$false] %s1311_s12 }
  0x1e   : > { %s1313_s14 = scalar_lea.vmem %s1312_s12, 6144  ;;  %p1314_p9 = scmp.lt.s32.totalorder %s1491_s15, %s1312_s12 }
  0x1f   : > { %p1309_p10 = pnand %p1307_p6, %p1293_p11  ;;  %p1315_p0 = scmp.lt.s32.totalorder %s1313_s14, %s1306_s28 }
  0x21   : > { %p1310_p12 = pneg %p1309_p10  ;;  %p1316_p1 = por %p1315_p0, %p1314_p9 }
  0x23   : > { %p1317_p2 = pnand %p1316_p1, %p1310_p12 }
  0x25   : > { %1320 = shalt.err (!%p1317_p2)
}
  0x26   : > { %s1392_s17 = smov 192   ;;  %s1393_s18 = smov 12  }
  0x27   : > { %1175 = dma.hbm_to_vmem [thread:$0]  (!%p1478_p8), %s1487_s13, 3072, %s1491_s15, %s228_s16, %s1392_s17, %s1392_s17, %s1393_s18  }
  0x28   : > { %p281_p9 = scmp.lt.s32.totalorder %s1389_s24, 3  ;;  %s1531_s21 = scalar_lea.hbm %s1708_s3, %s1163_s9 }
  0x29   : > { %p1715_p13 = scmp.ge.s32.totalorder %s1389_s24, 1  ;;  %s252_s28 = scalar_lea.vmem [#allocation5], %s1162_s8 }
  0x2a   : > { %s259_s11 = sshll.u32 %s252_s28, 4  ;;  %s249_s13 = scalar_lea.sflag [#allocation6], %s1474_s7  ;;  %s1541_s11 = int_to_ptr.vmem [resolvable:$true] %s259_s11 }
  0x2b   : > { %p1535_p3 = pnand %p1715_p13, %p281_p9  ;;  %s1321_s15 = scalar_lea.hbm %s1531_s21, 3072 }
  0x2c   : > { %p1322_p4 = scmp.ne.s32.totalorder %s1531_s21, %s1321_s15  ;;  %s1326_s16 = scalar_lea.hbm %s1708_s3, 6144 }
  0x2d   : > { %p1327_p10 = scmp.lt.u32.totalorder %s1531_s21, %s1708_s3  ;;  %p1328_p12 = scmp.lt.u32.totalorder %s1326_s16, %s1321_s15 }
  0x2e   : > { %p1324_p5 = pnand %p1322_p4, %p1293_p11  ;;  %p1330_p1 = scmp.lt.u32.totalorder %s1321_s15, %s1531_s21 }
  0x2f   : > { %p1329_p0 = por %p1328_p12, %p1327_p10 }
  0x30   : > { %p1325_p6 = pneg %p1324_p5 }
  0x31   : > { %p1331_p2 = por %p1330_p1, %p1329_p0 }
  0x33   : > { %p1332_p9 = pnand %p1331_p2, %p1325_p6 }
  0x35   : > { %1335 = shalt.err (!%p1332_p9)
}
  0x36   : > { %s1336_s8 = scalar_lea.vmem %s1541_s11, 3072  ;;  %s1394_s19 = smov [#allocation5]  }
  0x37   : > { %p1337_p13 = scmp.ne.s32.totalorder %s1541_s11, %s1336_s8  ;;  %s1341_s20 = sshll.u32 %s1394_s19, 4  ;;  %s1342_s20 = int_to_ptr.vmem [resolvable:$false] %s1341_s20 }
  0x38   : > { %s1343_s28 = scalar_lea.vmem %s1342_s20, 6144  ;;  %p1344_p7 = scmp.lt.s32.totalorder %s1541_s11, %s1342_s20 }
  0x39   : > { %p1339_p4 = pnand %p1337_p13, %p1293_p11  ;;  %p1345_p10 = scmp.lt.s32.totalorder %s1343_s28, %s1336_s8 }
  0x3b   : > { %p1340_p5 = pneg %p1339_p4  ;;  %p1346_p12 = por %p1345_p10, %p1344_p7 }
  0x3d   : > { %p1347_p0 = pnand %p1346_p12, %p1340_p5 }
  0x3f   : > { %1350 = shalt.err (!%p1347_p0)
}
  0x40   : > { %1178 = dma.hbm_to_vmem [thread:$0]  (!%p1478_p8), %s1531_s21, 3072, %s1541_s11, %s249_s13, %s1392_s17, %s1392_s17, %s1393_s18  }
  0x41   : > { %285 = sbr.rel (%p1535_p3) target bundleno = 411 (0x19b), region = 44  ;;  %s287_s15 = sand.u32 (!%p1535_p3), 1, %s1381_s22  }
  0x42   : > { %s1166_s24 = smul.u32 (!%p1535_p3), 192, %s287_s15  ;;  %s288_s9 = scalar_lea.sflag (!%p1535_p3), [#allocation4], %s287_s15 }
  0x43   : > { %p1717_p7 = scmp.ne.s32.totalorder (!%p1535_p3), %s1713_s30, 0 }
  0x44   : > { %s1575_s16 = scalar_lea.vmem (!%p1535_p3), [#allocation3], %s1166_s24 }
  0x48   : > { %1368 = dma.done.wait (%p1717_p7), %s288_s9, 3072  }
  0x49   : > { %1370 = vsyncadd (%p1717_p7), %s288_s9, 4294964224  ;;  %s297_s7 = scalar_lea.sflag [#allocation6], %s287_s15  ;;  %s1581_s10 = scalar_lea.vmem [#allocation5], %s1166_s24 }
  0x4a   : > { %1372 = dma.done.wait (%p1717_p7), %s297_s7, 3072  }
  0x4b   : > { %1374 = vsyncadd (%p1717_p7), %s297_s7, 4294964224  ;;  %p345_p8 = scmp.lt.s32.totalorder %s1452_s25, 1  ;;  %p1043_p11 = scmp.ne.s32.totalorder %s1452_s25, 0 }
  0x4c   : > { %v366_v0 = vld [vmem:[%s1705_s0] sm:$0xff] (!%p1043_p11) }
  0x4d   : > { %s346_s17 = scalar_select %p345_p8, %s1452_s25, 1 }
  0x4e   : > { %365 = sbr.rel (%p1043_p11) target bundleno = 85 (0x55), region = 56  ;;  %367 = vst [vmem:[#allocation2] sm:$0xff] (!%p1043_p11), %v366_v0 }
  0x4f   : > { %s1041_s18 = sshll.u32 %s346_s17, 3  ;;  %s1167_s21 = smul.u32 3, %s346_s17 }
  0x50   : > { %s1592_s13 = scalar_lea.vmem %s1706_s1, %s1041_s18  ;;  %s1597_s8 = scalar_lea.vmem %s1711_s6, %s1041_s18 }
  0x51   : > { %s1602_s30 = scalar_lea.vmem %s1709_s4, %s1167_s21  ;;  %s1607_s24 = scalar_lea.vmem %s1710_s5, %s1167_s21 }
  0x55 PF: > { %v1217_v1 = vld [vmem:[%s1575_s16 + $0x4] ss:$12 sps:$4 sm:$0xff]   ;;  %v1219_v2 = vld [vmem:[%s1575_s16] ss:$12 sps:$4 sm:$0xff]   ;;  %v1395_v3 = vmov 0.0   ;;  %v1396_v4 = vmov 0   ;;  %v405_v59 = vlaneseq }
  0x56   : > { %1114 = vmatprep.subr.bf16.mxu1 %v1395_v3  ;;  %580 = vmatprep.mubr.bf16.mxu0 %v1396_v4  ;;  %v1220_v5 = vld [vmem:[%s1575_s16 + $0x1c] ss:$12 sps:$4 sm:$0xff]   ;;  %vm1397_vm0 = vmmov 0   ;;  %v1222_v6 = vld [vmem:[%s1575_s16 + $0x18] ss:$12 sps:$4 sm:$0xff]  }
  0x57   : > { %548 = vmatprep.subr.bf16.mxu0 %v1217_v1  ;;  %1130 = vmatprep.mubr.msk.bf16.mxu1 %vm1397_vm0, %v1395_v3  ;;  %v1223_v7 = vld [vmem:[%s1575_s16 + $0x34] ss:$12 sps:$4 sm:$0xff]   ;;  %v1225_v8 = vld [vmem:[%s1575_s16 + $0x30] ss:$12 sps:$4 sm:$0xff]   ;;  %v1226_v9 = vld [vmem:[%s1575_s16 + $0x4c] ss:$12 sps:$4 sm:$0xff]  }
  0x58   : > { %549 = vmatpush1.bf16.msra.mxu0 %v1219_v2  ;;  %v1237_v10 = vld [vmem:[%s1575_s16 + $0x8] ss:$12 sps:$4 sm:$0xff]   ;;  %v1229_v12 = vld [vmem:[%s1575_s16 + $0x64] ss:$12 sps:$4 sm:$0xff]   ;;  %v1241_v13 = vld [vmem:[%s1575_s16 + $0x20] ss:$12 sps:$4 sm:$0xff]  }
  0x59   : > { %550 = vmatprep.subr.bf16.mxu0 %v1220_v5  ;;  %v1228_v11 = vld [vmem:[%s1575_s16 + $0x48] ss:$12 sps:$4 sm:$0xff]   ;;  %1115 = vmatpush3.bf16.msra.mxu1 %v1237_v10  ;;  %v1231_v14 = vld [vmem:[%s1575_s16 + $0x60] ss:$12 sps:$4 sm:$0xff]   ;;  %v1243_v15 = vld [vmem:[%s1575_s16 + $0x38] ss:$12 sps:$4 sm:$0xff]  }
  0x5a   : > { %1116 = vmatprep.subr.bf16.mxu1 %v1395_v3  ;;  %v1232_v16 = vld [vmem:[%s1575_s16 + $0x7c] ss:$12 sps:$4 sm:$0xff]   ;;  %v1234_v17 = vld [vmem:[%s1575_s16 + $0x78] ss:$12 sps:$4 sm:$0xff]   ;;  %v1235_v19 = vld [vmem:[%s1575_s16 + $0x94] ss:$12 sps:$4 sm:$0xff]  }
  0x5b   : > { %v1247_v18 = vld [vmem:[%s1575_s16 + $0x50] ss:$12 sps:$4 sm:$0xff]   ;;  %v1251_v21 = vld [vmem:[%s1575_s16 + $0x68] ss:$12 sps:$4 sm:$0xff]   ;;  %v1239_v22 = vld [vmem:[%s1575_s16 + $0xac] ss:$12 sps:$4 sm:$0xff]  }
  0x5c   : > { %551 = vmatpush1.bf16.msra.mxu0 %v1222_v6  ;;  %v1238_v20 = vld [vmem:[%s1575_s16 + $0x90] ss:$12 sps:$4 sm:$0xff]   ;;  %v1242_v23 = vld [vmem:[%s1575_s16 + $0xa8] ss:$12 sps:$4 sm:$0xff]   ;;  %v1255_v25 = vld [vmem:[%s1575_s16 + $0x80] ss:$12 sps:$4 sm:$0xff]  }
  0x5d   : > { %552 = vmatprep.subr.bf16.mxu0 %v1223_v7  ;;  %1117 = vmatpush3.bf16.msra.mxu1 %v1241_v13  ;;  %v368_v24 = vld [vmem:[#allocation2] sm:$0xff]  ;;  %v1246_v26 = vld [vmem:[%s1581_s10 + $0x4] ss:$12 sps:$4 sm:$0xff]   ;;  %v1244_v28 = vld [vmem:[%s1581_s10] ss:$12 sps:$4 sm:$0xff]   ;;  %v406_v60 = vshrl.u32 %v405_v59, 7 }
  0x5e   : > { %1118 = vmatprep.subr.bf16.mxu1 %v1395_v3  ;;  %v369_v27 = vpack.c.bf16 %v368_v24, %v368_v24  ;;  %v1259_v29 = vld [vmem:[%s1575_s16 + $0x98] ss:$12 sps:$4 sm:$0xff]   ;;  %v1250_v30 = vld [vmem:[%s1581_s10 + $0x1c] ss:$12 sps:$4 sm:$0xff]   ;;  %v1254_v33 = vld [vmem:[%s1581_s10 + $0x34] ss:$12 sps:$4 sm:$0xff]  }
  0x5f   : > { %v1248_v31 = vld [vmem:[%s1581_s10 + $0x18] ss:$12 sps:$4 sm:$0xff]   ;;  %v1263_v32 = vld [vmem:[%s1575_s16 + $0xb0] ss:$12 sps:$4 sm:$0xff]   ;;  %v1270_v35 = vld [vmem:[%s1581_s10 + $0x8] ss:$12 sps:$4 sm:$0xff]  }
  0x60   : > { %553 = vmatpush1.bf16.msra.mxu0 %v1225_v8  ;;  %v1252_v34 = vld [vmem:[%s1581_s10 + $0x30] ss:$12 sps:$4 sm:$0xff]   ;;  %v1258_v36 = vld [vmem:[%s1581_s10 + $0x4c] ss:$12 sps:$4 sm:$0xff]   ;;  %v1256_v37 = vld [vmem:[%s1581_s10 + $0x48] ss:$12 sps:$4 sm:$0xff]  }
  0x61   : > { %554 = vmatprep.subr.bf16.mxu0 %v1226_v9  ;;  %1119 = vmatpush3.bf16.msra.mxu1 %v1243_v15  ;;  %v1274_v38 = vld [vmem:[%s1581_s10 + $0x20] ss:$12 sps:$4 sm:$0xff]   ;;  %v1262_v39 = vld [vmem:[%s1581_s10 + $0x64] ss:$12 sps:$4 sm:$0xff]   ;;  %v1266_v42 = vld [vmem:[%s1581_s10 + $0x7c] ss:$12 sps:$4 sm:$0xff]  }
  0x62   : > { %1120 = vmatprep.subr.bf16.mxu1 %v1395_v3  ;;  %v1260_v40 = vld [vmem:[%s1581_s10 + $0x60] ss:$12 sps:$4 sm:$0xff]   ;;  %v1275_v41 = vld [vmem:[%s1581_s10 + $0x38] ss:$12 sps:$4 sm:$0xff]   ;;  %v1276_v44 = vld [vmem:[%s1581_s10 + $0x50] ss:$12 sps:$4 sm:$0xff]  }
  0x63   : > { %v1264_v43 = vld [vmem:[%s1581_s10 + $0x78] ss:$12 sps:$4 sm:$0xff]   ;;  %v1269_v45 = vld [vmem:[%s1581_s10 + $0x94] ss:$12 sps:$4 sm:$0xff]   ;;  %v1267_v46 = vld [vmem:[%s1581_s10 + $0x90] ss:$12 sps:$4 sm:$0xff]  }
  0x64   : > { %555 = vmatpush1.bf16.msra.mxu0 %v1228_v11  ;;  %v1277_v47 = vld [vmem:[%s1581_s10 + $0x68] ss:$12 sps:$4 sm:$0xff]   ;;  %v1273_v48 = vld [vmem:[%s1581_s10 + $0xac] ss:$12 sps:$4 sm:$0xff]   ;;  %v1280_v54 = vld [vmem:[%s1581_s10 + $0xb0] ss:$12 sps:$4 sm:$0xff]  }
  0x65   : > { %556 = vmatprep.subr.bf16.mxu0 %v1229_v12  ;;  %1121 = vmatpush3.bf16.msra.mxu1 %v1247_v18  ;;  %v1271_v49 = vld [vmem:[%s1581_s10 + $0xa8] ss:$12 sps:$4 sm:$0xff]   ;;  %v1678_v50 = vld [vmem:[%s1592_s13] sm:$0xff]  ;;  %v1278_v51 = vld [vmem:[%s1581_s10 + $0x80] ss:$12 sps:$4 sm:$0xff]   ;;  %v407_v61 = vsub.s32 0, %v406_v60 }
  0x66   : > { %1122 = vmatprep.subr.bf16.mxu1 %v1395_v3  ;;  %v629_v52 = vpack.c.bf16 %v1678_v50, %v1678_v50  ;;  %v1279_v53 = vld [vmem:[%s1581_s10 + $0x98] ss:$12 sps:$4 sm:$0xff]   ;;  %v411_v0 = vsub.s32 1, %v406_v60 }
  0x67   : > { %v662_v62 = vld [vmem:[%s1607_s24] sm:$0x7] }
  0x68   : > { %557 = vmatpush1.bf16.msra.mxu0 %v1231_v14  ;;  %v403_v63 = vld [vmem:[%s1602_s30] sm:$0x7]  ;;  %v667_v2 = vrot.slane %v662_v62, %v407_v61  ;;  %v671_v5 = vrot.slane %v662_v62, %v411_v0 }
  0x69   : > { %558 = vmatprep.subr.bf16.mxu0 %v1232_v16  ;;  %1123 = vmatpush3.bf16.msra.mxu1 %v1251_v21  ;;  %v408_v1 = vrot.slane %v403_v63, %v407_v61  ;;  %v415_v21 = vsub.s32 2, %v406_v60 }
  0x6a   : > { %1124 = vmatprep.subr.bf16.mxu1 %v1395_v3 }
  0x6b   : > { %v1154_v6 = vadd.f32 %v667_v2, %v408_v1  ;;  %v416_v24 = vrot.slane %v403_v63, %v415_v21 }
  0x6c   : > { %559 = vmatpush1.bf16.msra.mxu0 %v1234_v17 }
  0x6d   : > { %560 = vmatprep.subr.bf16.mxu0 %v1235_v19  ;;  %1125 = vmatpush3.bf16.msra.mxu1 %v1255_v25 }
  0x6e   : > { %1126 = vmatprep.subr.bf16.mxu1 %v1395_v3 }
  0x70   : > { %561 = vmatpush1.bf16.msra.mxu0 %v1238_v20 }
  0x71   : > { %562 = vmatprep.subr.bf16.mxu0 %v1239_v22  ;;  %1127 = vmatpush3.bf16.msra.mxu1 %v1259_v29  ;;  %v675_v22 = vrot.slane %v662_v62, %v415_v21 }
  0x72   : > { %1128 = vmatprep.subr.bf16.mxu1 %v1395_v3 }
  0x74   : > { %563 = vmatpush1.bf16.msra.mxu0 %v1242_v23 }
  0x75   : > { %807 = vmatprep.subr.bf16.mxu0 %v1246_v26  ;;  %1129 = vmatpush3.bf16.msra.mxu1 %v1263_v32 }
  0x76   : > { %1134 = vmatprep.subr.bf16.mxu1 %v1395_v3 }
  0x77   : > { %581 = vmatmul.mubr.bf16.vlgmr.msra.gmra.mrb[0].mxu0 %v369_v27 }
  0x78   : > { %808 = vmatpush1.bf16.msra.mxu0 %v1244_v28  ;;  %839 = vmatprep.mubr.bf16.mxu0 %v1396_v4  ;;  %v412_v4 = vrot.slane %v403_v63, %v411_v0 }
  0x79   : > { %809 = vmatprep.subr.bf16.mxu0 %v1250_v30  ;;  %1131 = vmatmul.mubr.bf16.vlgmr.msra.gmra.mrb[0].mxu1 %v369_v27 }
  0x7a   : > { %1135 = vmatpush3.bf16.msra.mxu1 %v1270_v35  ;;  %1150 = vmatprep.mubr.msk.bf16.mxu1 %vm1397_vm0, %v1395_v3  ;;  %v1156_v8 = vadd.f32 %v671_v5, %v412_v4 }
  0x7b   : > { %1136 = vmatprep.subr.bf16.mxu1 %v1395_v3 }
  0x7c   : > { %810 = vmatpush1.bf16.msra.mxu0 %v1248_v31 }
  0x7d   : > { %811 = vmatprep.subr.bf16.mxu0 %v1254_v33 }
  0x7e   : > { %1137 = vmatpush3.bf16.msra.mxu1 %v1274_v38 }
  0x7f   : > { %1138 = vmatprep.subr.bf16.mxu1 %v1395_v3 }
  0x80   : > { %812 = vmatpush1.bf16.msra.mxu0 %v1252_v34 }
  0x81   : > { %813 = vmatprep.subr.bf16.mxu0 %v1258_v36 }
  0x82   : > { %1139 = vmatpush3.bf16.msra.mxu1 %v1275_v41 }
  0x83   : > { %1140 = vmatprep.subr.bf16.mxu1 %v1395_v3 }
  0x84   : > { %814 = vmatpush1.bf16.msra.mxu0 %v1256_v37 }
  0x85   : > { %815 = vmatprep.subr.bf16.mxu0 %v1262_v39 }
  0x86   : > { %1141 = vmatpush3.bf16.msra.mxu1 %v1276_v44 }
  0x87   : > { %1142 = vmatprep.subr.bf16.mxu1 %v1395_v3 }
  0x88   : > { %816 = vmatpush1.bf16.msra.mxu0 %v1260_v40 }
  0x89   : > { %817 = vmatprep.subr.bf16.mxu0 %v1266_v42 }
  0x8a   : > { %1143 = vmatpush3.bf16.msra.mxu1 %v1277_v47 }
  0x8b   : > { %1144 = vmatprep.subr.bf16.mxu1 %v1395_v3 }
  0x8c   : > { %818 = vmatpush1.bf16.msra.mxu0 %v1264_v43 }
  0x8d   : > { %819 = vmatprep.subr.bf16.mxu0 %v1269_v45 }
  0x8e   : > { %1145 = vmatpush3.bf16.msra.mxu1 %v1278_v51 }
  0x8f   : > { %1146 = vmatprep.subr.bf16.mxu1 %v1395_v3 }
  0x90   : > { %820 = vmatpush1.bf16.msra.mxu0 %v1267_v46 }
  0x91   : > { %821 = vmatprep.subr.bf16.mxu0 %v1273_v48 }
  0x92   : > { %1147 = vmatpush3.bf16.msra.mxu1 %v1279_v53 }
  0x93   : > { %1148 = vmatprep.subr.bf16.mxu1 %v1395_v3 }
  0x94   : > { %822 = vmatpush1.bf16.msra.mxu0 %v1271_v49 }
  0x96   : > { %1149 = vmatpush3.bf16.msra.mxu1 %v1280_v54 }
  0x97   : > { %840 = vmatmul.mubr.bf16.vlgmr.msra.gmra.mrb[0].mxu0 %v629_v52 }
  0x99   : > { %1151 = vmatmul.mubr.bf16.vlgmr.msra.gmra.mrb[4].mxu1 %v629_v52 }
 0x14c   : > { %v623_v55 = vpop.f32.mrb[0].mxu1 }
 0x14d   : > { %v1132_v56 = vpop.f32.mrb[1].mxu1  ;;  %v624_v28 = vadd.f32 %v623_v55, %v416_v24 }
 0x14e   : > { %v626_v57 = vpop.f32.mrb[2].mxu1 }
 0x14f   : > { %v1133_v58 = vpop.f32.mrb[3].mxu1 }
 0x16a   : > { %v841_v7 = vpop.f32.mrb[0].mxu0 }
 0x16b   : > { %v1155_v3 = vadd.f32 %v1154_v6, %v841_v7  ;;  %v843_v9 = vpop.f32.mrb[1].mxu0 }
 0x16c   : > { %v845_v10 = vpop.f32.mrb[2].mxu0  ;;  %v1157_v13 = vadd.f32 %v1156_v8, %v843_v9  ;;  %v882_v15 = vpop.f32.mrb[4].mxu1 }
 0x16d   : > { %v1092_v11 = vmul.f32 -1.442695, %v1155_v3  ;;  %v846_v12 = vpop.f32.mrb[3].mxu0  ;;  %v1152_v16 = vpop.f32.mrb[5].mxu1  ;;  %v883_v26 = vadd.f32 %v882_v15, %v675_v22 }
 0x16e   : > { %v1093_v14 = vmul.f32 -1.442695, %v1157_v13  ;;  %v885_v17 = vpop.f32.mrb[6].mxu1 }
 0x16f   : > { %1281 = vpow2.f32 %v1092_v11  ;;  %v1153_v18 = vpop.f32.mrb[7].mxu1 }
 0x170   : > { %1283 = vpow2.f32 %v1093_v14 }
 0x179   : > { %v1282_v19 = vpop.eup %1281 }
 0x17a   : > { %v892_v20 = vadd.f32 1.0, %v1282_v19  ;;  %v1284_v23 = vpop.eup %1283 }
 0x17b   : > { %v899_v25 = vadd.f32 1.0, %v1284_v23 }
 0x17c   : > { %1285 = vrcp.f32 %v892_v20 }
 0x17d   : > { %1287 = vrcp.f32 %v899_v25 }
 0x186   : > { %v1286_v27 = vpop.eup %1285 }
 0x187   : > { %v902_v29 = vmul.f32 %v1286_v27, %v883_v26  ;;  %v1288_v31 = vpop.eup %1287 }
 0x188   : > { %v905_v32 = vsub.f32 1.0, %v1288_v31  ;;  %v907_v34 = vmul.f32 %v1288_v31, %v1678_v50 }
 0x189   : > { %v903_v30 = vadd.f32 %v902_v29, %v624_v28 }
 0x18b   : > { %1289 = vtanh.f32 %v903_v30 }
 0x195   : > { %v1290_v33 = vpop.eup %1289 }
 0x196   : > { %v906_v35 = vmul.f32 %v1290_v33, %v905_v32 }
 0x198   : > { %v908_v36 = vadd.f32 %v907_v34, %v906_v35 }
 0x19a   : > { %909 = vst [vmem:[%s1597_s8] sm:$0xff] %v908_v36  ;;  %910 = vst [vmem:[#allocation2] sm:$0xff] %v908_v36 }
 0x19b PF: > { %p19_p3 = scmp.ge.s32.totalorder %s1455_s26, 4   ;;  %s1718_s21 = smov %s1381_s22 }
 0x19c   : > { %s1719_s22 = smov %s1385_s23  ;;  %s1720_s23 = smov %s1465_s29 }
 0x19d   : > { %s1721_s24 = smov %s1455_s26  ;;  %21 = sbr.rel (!%p19_p3) target bundleno = 5 (0x5), region = 110 }
 0x1a4   :  { %930 = vsyncpa [#allocation4], 1 }
 0x1a5   :  { %932 = vsyncpa [#allocation4 + $0x1], 1 }
 0x1a6   :  { %933 = vsyncpa [#allocation6], 1 }
 0x1a7   :  { %935 = vsyncpa [#allocation6 + $0x1], 1 }

</bundles_post_ra>
